<compile_context>
chip_gen: v5e
topology: v5e:2x2
jax: 0.10.0
libtpu: 0.0.40
codegen_flags: <defaults>
</compile_context>

<pallas_src>
import functools

import numpy as np
import jax
import jax.numpy as jnp
from jax import lax
from jax.experimental import pallas as pl
from jax.experimental.pallas import tpu as pltpu

# --- constants that the PyTorch module imports from elsewhere ----------------
MIC_DISTANCE_FROM_WALL = 0.5
MIN_SPEAKER_HEIGHT = 1.0
MAX_SPEAKER_HEIGHT = 2.0
SPEED_OF_SOUND = 343.0

# Mask value folded into the matmul for padded grid columns.  Correct only
# because (a) real SRP powers are O(C) >> -1e30 and (b) padded columns sit at
# the tail of G, so a padded tile can never win the strict '>' running-max
# carry.  Do not change the W column ordering or this magnitude independently.
_NEG_BIG = -1e30
_B_PAD = 8  # pad batch to one full sublane group (unmasked MXU feed / stores)


def _round_up(x, m):
    return ((x + m - 1) // m) * m


# ----------------------------------------------------------------------------
# init()-equivalent setup (plain numpy, deterministic)
# ----------------------------------------------------------------------------
def build_candidate_grid(room_dimensions, density):
    xs = np.arange(MIC_DISTANCE_FROM_WALL, room_dimensions[0] + density[0], density[0])
    ys = np.arange(0.0, room_dimensions[1] + density[1], density[1])
    zs = np.arange(MIN_SPEAKER_HEIGHT, MAX_SPEAKER_HEIGHT + density[2], density[2])
    pts = np.array([[x, y, z] for x in xs for y in ys for z in zs], dtype=np.float32)
    return pts  # (G, 3)


def true_tdoa(x, rec_pairs, sampling_rate):
    # x: (G, 3), rec_pairs: (C, 2, 3) -> tdoa in samples, shape (G, C)
    d = np.linalg.norm(x[:, None, None, :] - rec_pairs[None, :, :, :], axis=-1)  # (G, C, 2)
    return (d[..., 0] - d[..., 1]) / SPEED_OF_SOUND * sampling_rate


def build_srp_weights(tau, n_lags, *, block_g=None, n_split=1, max_block_g=8192):
    """Build the 0/1 gather matrix W once at init time (tau is fixed geometry).

    W[c*L + tau[g, c], g] = 1 for real grid columns; a bias row routes the
    _NEG_BIG entry of cc_flat only into padded grid columns.  Stored as bf16
    (exact for 0/1) to halve the HBM-bound W stream.
    """
    tau = np.asarray(tau, np.int64)
    g, c = tau.shape
    k = c * n_lags
    k_pad = max(_round_up(k + 1, 128), 128)  # +1 slot for the mask bias row

    if block_g is None:
        per_split = -(-g // n_split)
        block_g = min(_round_up(per_split, 128), max_block_g)
    g_pad = _round_up(g, n_split * block_g)
    steps_per_split = g_pad // (n_split * block_g)

    w = np.zeros((k_pad, g_pad), np.float32)
    rows = (tau + np.arange(c)[None, :] * n_lags).reshape(-1)
    cols = np.repeat(np.arange(g), c)
    w[rows, cols] = 1.0
    w[k, g:] = 1.0  # bias row -> padded columns only

    meta = dict(k=k, k_pad=k_pad, g=g, g_pad=g_pad, block_g=block_g,
                n_split=n_split, steps_per_split=steps_per_split)
    return jnp.asarray(w, dtype=jnp.bfloat16), meta


# ----------------------------------------------------------------------------
# GCC-PHAT front-end (plain JAX glue)
# ----------------------------------------------------------------------------
def gcc_phat(sig_pairs, max_tau):
    # sig_pairs: (..., C, 2, T) -> cc: (..., C, 2*max_tau+1)
    # TODO(synk): FFT has no clean Pallas TPU equivalent; spectral step stays in JAX.
    n = sig_pairs.shape[-1]
    X = jnp.fft.rfft(sig_pairs.astype(jnp.float32), n=n, axis=-1)
    R = X[..., 0, :] * jnp.conj(X[..., 1, :])
    R = R / (jnp.abs(R) + 1e-12)  # PHAT weighting
    cc = jnp.fft.irfft(R, n=n, axis=-1)
    cc = jnp.concatenate([cc[..., -max_tau:], cc[..., : max_tau + 1]], axis=-1)
    return cc.astype(jnp.float32)


# ----------------------------------------------------------------------------
# Pallas kernel: fused one-hot-matmul SRP power + running argmax carry
# ----------------------------------------------------------------------------
def _srp_kernel(cc_ref, w_ref, *out_refs, block_g, steps_per_split, return_power):
    if return_power:
        p_ref, val_ref, idx_ref = out_refs
    else:
        val_ref, idx_ref = out_refs
        p_ref = None

    s = pl.program_id(0)     # parallel split (megacore) axis
    gi = pl.program_id(1)    # sequential grid-tile axis within the split

    @pl.when(gi == 0)
    def _():
        val_ref[0, :, :] = jnp.full(val_ref.shape[1:], -jnp.inf, jnp.float32)
        idx_ref[0, :, :] = jnp.zeros(idx_ref.shape[1:], jnp.int32)

    # Fused one-hot gather + pair sum for the whole tile:
    #   (B_pad, K_pad) @ (K_pad, block_g) -> (B_pad, block_g)
    # W is bf16 0/1 in HBM; upcast to f32 here so the powers stay f32-exact.
    # Padded grid columns receive _NEG_BIG via the bias row of W.
    acc = jnp.dot(cc_ref[...], w_ref[...].astype(jnp.float32),
                  preferred_element_type=jnp.float32)

    if p_ref is not None:
        p_ref[...] = acc

    base = (s * steps_per_split + gi) * block_g
    col_id = base + lax.broadcasted_iota(jnp.int32, acc.shape, 1)

    # within-tile argmax, first occurrence
    local_max = jnp.max(acc, axis=-1, keepdims=True)                     # (B_pad, 1)
    cand = jnp.where(acc == local_max, col_id, jnp.iinfo(jnp.int32).max)
    local_arg = jnp.min(cand, axis=-1, keepdims=True)                    # (B_pad, 1)

    # running carry across tiles (strict '>' keeps the earliest tile on ties)
    prev_val = val_ref[0, :, :]
    prev_idx = idx_ref[0, :, :]
    better = local_max > prev_val
    val_ref[0, :, :] = jnp.where(better, local_max, prev_val)
    idx_ref[0, :, :] = jnp.where(better, local_arg, prev_idx)


def srp_power_argmax(cc, w, meta, return_power=False):
    """cc: (B, C, L) f32, w: (K_pad, G_pad) bf16 0/1 gather matrix (from init).

    Returns the argmax index (B,) int32, and additionally the SRP power map
    P (B, G) f32 if return_power is True.
    """
    batch, n_pairs, n_lags = cc.shape
    k, k_pad = meta["k"], meta["k_pad"]
    g, g_pad = meta["g"], meta["g_pad"]
    block_g, n_split = meta["block_g"], meta["n_split"]
    steps = meta["steps_per_split"]
    assert n_pairs * n_lags == k

    b_pad = max(_round_up(batch, _B_PAD), _B_PAD)

    # lane-dense flattened cc (f32) with a bias column masking padded grid cols
    cc_flat = jnp.zeros((b_pad, k_pad), jnp.float32)
    cc_flat = cc_flat.at[:batch, :k].set(cc.reshape(batch, k))
    cc_flat = cc_flat.at[:, k].set(_NEG_BIG)

    kernel = functools.partial(
        _srp_kernel, block_g=block_g, steps_per_split=steps,
        return_power=return_power)

    out_shape = (
        jax.ShapeDtypeStruct((n_split, b_pad, 1), jnp.float32),   # per-split best value
        jax.ShapeDtypeStruct((n_split, b_pad, 1), jnp.int32),     # per-split best index
    )
    out_specs = (
        pl.BlockSpec((1, b_pad, 1), lambda s, gi: (s, 0, 0)),
        pl.BlockSpec((1, b_pad, 1), lambda s, gi: (s, 0, 0)),
    )
    if return_power:
        out_shape = (jax.ShapeDtypeStruct((b_pad, g_pad), jnp.float32),) + out_shape
        out_specs = (pl.BlockSpec(
            (b_pad, block_g), lambda s, gi: (0, s * steps + gi)),) + out_specs

    # Explicit scoped-VMEM budget: double-buffered bf16 W tile + f32 cc +
    # (optional) f32 P tile, with headroom; sized to stay safe on v7x (64 MiB).
    vmem_bytes = (2 * k_pad * block_g * 2
                  + 2 * b_pad * k_pad * 4
                  + (2 * b_pad * block_g * 4 if return_power else 0))
    vmem_limit = int(min(96 * 2**20, max(16 * 2**20, 2 * vmem_bytes + (4 << 20))))

    outs = pl.pallas_call(
        kernel,
        out_shape=out_shape,
        grid_spec=pltpu.PrefetchScalarGridSpec(
            num_scalar_prefetch=0,
            grid=(n_split, steps),
            in_specs=[
                pl.BlockSpec((b_pad, k_pad), lambda s, gi: (0, 0)),       # full cc
                pl.BlockSpec((k_pad, block_g),
                             lambda s, gi: (0, s * steps + gi)),          # W tile (bf16)
            ],
            out_specs=out_specs,
        ),
        compiler_params=pltpu.CompilerParams(
            dimension_semantics=("parallel", "arbitrary"),
            vmem_limit_bytes=vmem_limit),
    )(cc_flat, w)

    if return_power:
        p_pad, vals, idxs = outs
    else:
        vals, idxs = outs

    # merge the per-split carries (lowest split wins ties -> first occurrence,
    # since splits cover G in order); trivial when n_split == 1.
    vals = vals[:, :batch, 0]                                          # (n_split, B)
    idxs = idxs[:, :batch, 0]                                          # (n_split, B)
    best_split = jnp.argmax(vals, axis=0)                              # (B,)
    idx = jnp.take_along_axis(idxs, best_split[None, :], axis=0)[0]    # (B,)

    if return_power:
        return p_pad[:batch, :g], idx
    return idx


# ----------------------------------------------------------------------------
# SRP_PHAT.forward equivalent
# ----------------------------------------------------------------------------
def srp_phat_forward(signal, x_grid, w, meta, combinations, rec_centroid, max_tau,
                     relative=True):
    # signal: (B, M, T)
    pairs = signal[:, combinations, :]          # (B, C, 2, T)
    cc = gcc_phat(pairs, max_tau)               # (B, C, 2*max_tau+1)
    idx = srp_power_argmax(cc, w, meta, return_power=False)
    x = x_grid[idx]                             # (B, 3)
    return x - rec_centroid if relative else x


# ----------------------------------------------------------------------------
if __name__ == "__main__":
    key = jax.random.PRNGKey(0)

    sampling_rate = 16000
    max_tau = 8
    density = [0.25, 0.25, 0.25]
    room_dimensions = (3.0, 3.0, 2.5)
    relative = True

    # 4 microphones, ~0.1 m aperture around the room centre
    receivers = np.array(
        [[1.45, 1.45, 1.2],
         [1.55, 1.45, 1.2],
         [1.45, 1.55, 1.2],
         [1.55, 1.55, 1.2]], dtype=np.float32)
    n_mics = receivers.shape[0]
    combinations = np.array(
        [(i, j) for i in range(n_mics) for j in range(i + 1, n_mics)], dtype=np.int32)
    rec_centroid = receivers.mean(axis=0)

    x_grid = build_candidate_grid(room_dimensions, density)                   # (G, 3)
    tdoa = true_tdoa(x_grid, receivers[combinations], sampling_rate)          # (G, C)
    tau = np.clip(max_tau + np.round(tdoa), 0, 2 * max_tau).astype(np.int32)  # (G, C)
    n_lags = 2 * max_tau + 1

    # init-time (once): one-hot gather matrix as bf16 device array.
    # For v7x pass n_split=2 to shard the leading "parallel" axis across TCs.
    w_bf16, meta = build_srp_weights(tau, n_lags, n_split=1)

    B, T = 2, 256
    signal = jax.random.normal(key, (B, n_mics, T), dtype=jnp.float32)

    signal_j = jnp.asarray(signal)
    x_grid_j = jnp.asarray(x_grid)
    comb_j = jnp.asarray(combinations)
    centroid_j = jnp.asarray(rec_centroid)

    out = srp_phat_forward(signal_j, x_grid_j, w_bf16, meta, comb_j, centroid_j,
                           max_tau, relative)
    out = jax.block_until_ready(out)

    # --- correctness check of the in-kernel SRP power map + argmax ----------
    cc = gcc_phat(signal_j[:, comb_j, :], max_tau)
    P_kernel, idx_kernel = srp_power_argmax(cc, w_bf16, meta, return_power=True)
    P_kernel = np.asarray(jax.block_until_ready(P_kernel))
    idx_kernel = np.asarray(jax.block_until_ready(idx_kernel))

    cc_np = np.asarray(cc)
    G, C = tau.shape
    P_ref = np.zeros((B, G), np.float32)
    for c in range(C):
        P_ref += cc_np[:, c, :][:, tau[:, c]]           # (B, G)
    np.testing.assert_allclose(P_kernel, P_ref, rtol=1e-4, atol=1e-4)

    # the kernel's argmax must attain the true maximum power
    np.testing.assert_allclose(P_ref[np.arange(B), idx_kernel],
                               P_ref.max(axis=-1), rtol=1e-5, atol=1e-5)

    # end-to-end output consistent with the kernel's selected grid point
    x_expected = x_grid[idx_kernel] - rec_centroid
    np.testing.assert_allclose(np.asarray(out), x_expected, rtol=1e-6, atol=1e-6)

    assert out.shape == (B, 3)
    print("KERNEL_OK")
</pallas_src>

<mosaic_0001>
module attributes {stable_mosaic.version = 11 : i64} {
  func.func @_srp_kernel(%arg0: i32, %arg1: i32, %arg2: memref<8x128xf32, #tpu.memory_space<vmem>>, %arg3: memref<128x768xbf16, #tpu.memory_space<vmem>>, %arg4: memref<1x8x1xf32, #tpu.memory_space<vmem>>, %arg5: memref<1x8x1xi32, #tpu.memory_space<vmem>>) attributes {dimension_semantics = [#tpu.dimension_semantics<parallel>, #tpu.dimension_semantics<arbitrary>], iteration_bounds = array<i64: 1, 1>, scalar_prefetch = 0 : i64, scratch_operands = 0 : i64, tpu.core_type = #tpu.core_type<tc>, window_params = [{pipeline_mode = #tpu.pipeline_mode<synchronous>, transform_indices = @transform_0, window_bounds = array<i64: 8, 128>}, {transform_indices = @transform_1, window_bounds = array<i64: 128, 768>}, {transform_indices = @transform_2, window_bounds = array<i64: 1, 8, 1>}, {transform_indices = @transform_3, window_bounds = array<i64: 1, 8, 1>}]} {
    %c0_i32 = arith.constant 0 : i32
    %0 = arith.cmpi eq, %arg1, %c0_i32 : i32
    %1 = arith.extui %0 : i1 to i32
    %c0_i32_0 = arith.constant 0 : i32
    %2 = arith.cmpi ne, %1, %c0_i32_0 : i32
    scf.if %2 {
      %cst_18 = arith.constant 0xFF800000 : f32
      %34 = vector.broadcast %cst_18 : f32 to vector<8x1xf32>
      %c0_19 = arith.constant 0 : index
      %c0_20 = arith.constant 0 : index
      %c0_21 = arith.constant 0 : index
      %35 = vector.load %arg4[%c0_19, %c0_20, %c0_21] : memref<1x8x1xf32, #tpu.memory_space<vmem>>, vector<1x8x1xf32>
      %36 = vector.shape_cast %35 : vector<1x8x1xf32> to vector<8x1xf32>
      %37 = vector.shape_cast %34 : vector<8x1xf32> to vector<1x8x1xf32>
      tpu.vector_store %arg4[%c0_19, %c0_20, %c0_21], %37 {strides = array<i32>} : memref<1x8x1xf32, #tpu.memory_space<vmem>>, vector<1x8x1xf32>,
      %c0_i32_22 = arith.constant 0 : i32
      %38 = vector.broadcast %c0_i32_22 : i32 to vector<8x1xi32>
      %c0_23 = arith.constant 0 : index
      %c0_24 = arith.constant 0 : index
      %c0_25 = arith.constant 0 : index
      %39 = vector.load %arg5[%c0_23, %c0_24, %c0_25] : memref<1x8x1xi32, #tpu.memory_space<vmem>>, vector<1x8x1xi32>
      %40 = vector.shape_cast %39 : vector<1x8x1xi32> to vector<8x1xi32>
      %41 = vector.shape_cast %38 : vector<8x1xi32> to vector<1x8x1xi32>
      tpu.vector_store %arg5[%c0_23, %c0_24, %c0_25], %41 {strides = array<i32>} : memref<1x8x1xi32, #tpu.memory_space<vmem>>, vector<1x8x1xi32>,
    } else {
    }
    %c0 = arith.constant 0 : index
    %c0_1 = arith.constant 0 : index
    %3 = vector.load %arg2[%c0, %c0_1] : memref<8x128xf32, #tpu.memory_space<vmem>>, vector<8x128xf32>
    %c0_2 = arith.constant 0 : index
    %c0_3 = arith.constant 0 : index
    %4 = vector.load %arg3[%c0_2, %c0_3] : memref<128x768xbf16, #tpu.memory_space<vmem>>, vector<128x768xbf16>
    %5 = arith.extf %4 : vector<128x768xbf16> to vector<128x768xf32>
    %cst = arith.constant dense<0.000000e+00> : vector<8x768xf32>
    %6 = tpu.matmul %3, %5, %cst {dimension_numbers = #tpu.dot_dimension_numbers<[1], [0], [0], [1], [0, 0, 1, 1], [], []>} : vector<8x128xf32>, vector<128x768xf32>, vector<8x768xf32> -> vector<8x768xf32>
    %c1_i32 = arith.constant 1 : i32
    %7 = arith.muli %arg0, %c1_i32 : i32
    %8 = arith.addi %7, %arg1 : i32
    %c768_i32 = arith.constant 768 : i32
    %9 = arith.muli %8, %c768_i32 : i32
    %10 = tpu.iota {dimensions = array<i32: 1>} : vector<8x768xi32>
    %11 = vector.broadcast %9 : i32 to vector<8x768xi32>
    %12 = arith.addi %11, %10 : vector<8x768xi32>
    %cst_4 = arith.constant dense<0xFF800000> : vector<8xf32>
    %13 = vector.multi_reduction <maximumf>, %6, %cst_4 [1] : vector<8x768xf32> to vector<8xf32>
    %14 = vector.shape_cast %13 : vector<8xf32> to vector<8x1xf32>
    %15 = vector.broadcast %14 : vector<8x1xf32> to vector<8x768xf32>
    %16 = arith.cmpf oeq, %6, %15 : vector<8x768xf32>
    %c2147483647_i32 = arith.constant 2147483647 : i32
    %17 = vector.broadcast %c2147483647_i32 : i32 to vector<8x768xi32>
    %18 = arith.select %16, %12, %17 : vector<8x768xi1>, vector<8x768xi32>
    %cst_5 = arith.constant dense<2147483647> : vector<8xi32>
    %19 = vector.multi_reduction <minsi>, %18, %cst_5 [1] : vector<8x768xi32> to vector<8xi32>
    %20 = vector.shape_cast %19 : vector<8xi32> to vector<8x1xi32>
    %c0_6 = arith.constant 0 : index
    %c0_7 = arith.constant 0 : index
    %c0_8 = arith.constant 0 : index
    %21 = vector.load %arg4[%c0_6, %c0_7, %c0_8] : memref<1x8x1xf32, #tpu.memory_space<vmem>>, vector<1x8x1xf32>
    %22 = vector.shape_cast %21 : vector<1x8x1xf32> to vector<8x1xf32>
    %c0_9 = arith.constant 0 : index
    %c0_10 = arith.constant 0 : index
    %c0_11 = arith.constant 0 : index
    %23 = vector.load %arg5[%c0_9, %c0_10, %c0_11] : memref<1x8x1xi32, #tpu.memory_space<vmem>>, vector<1x8x1xi32>
    %24 = vector.shape_cast %23 : vector<1x8x1xi32> to vector<8x1xi32>
    %25 = arith.cmpf ogt, %14, %22 : vector<8x1xf32>
    %26 = arith.select %25, %14, %22 : vector<8x1xi1>, vector<8x1xf32>
    %c0_12 = arith.constant 0 : index
    %c0_13 = arith.constant 0 : index
    %c0_14 = arith.constant 0 : index
    %27 = vector.load %arg4[%c0_12, %c0_13, %c0_14] : memref<1x8x1xf32, #tpu.memory_space<vmem>>, vector<1x8x1xf32>
    %28 = vector.shape_cast %27 : vector<1x8x1xf32> to vector<8x1xf32>
    %29 = vector.shape_cast %26 : vector<8x1xf32> to vector<1x8x1xf32>
    tpu.vector_store %arg4[%c0_12, %c0_13, %c0_14], %29 {strides = array<i32>} : memref<1x8x1xf32, #tpu.memory_space<vmem>>, vector<1x8x1xf32>,
    %30 = arith.select %25, %20, %24 : vector<8x1xi1>, vector<8x1xi32>
    %c0_15 = arith.constant 0 : index
    %c0_16 = arith.constant 0 : index
    %c0_17 = arith.constant 0 : index
    %31 = vector.load %arg5[%c0_15, %c0_16, %c0_17] : memref<1x8x1xi32, #tpu.memory_space<vmem>>, vector<1x8x1xi32>
    %32 = vector.shape_cast %31 : vector<1x8x1xi32> to vector<8x1xi32>
    %33 = vector.shape_cast %30 : vector<8x1xi32> to vector<1x8x1xi32>
    tpu.vector_store %arg5[%c0_15, %c0_16, %c0_17], %33 {strides = array<i32>} : memref<1x8x1xi32, #tpu.memory_space<vmem>>, vector<1x8x1xi32>,
    return
  }
  func.func @transform_0(%arg0: i32, %arg1: i32) -> (i32, i32) {
    %c0_i32 = arith.constant 0 : i32
    %c0_i32_0 = arith.constant 0 : i32
    %c0_i32_1 = arith.constant 0 : i32
    return %c0_i32, %c0_i32_0 : i32, i32
  }
  func.func @transform_1(%arg0: i32, %arg1: i32) -> (i32, i32) {
    %c1_i32 = arith.constant 1 : i32
    %0 = arith.muli %arg0, %c1_i32 : i32
    %1 = arith.addi %0, %arg1 : i32
    %c0_i32 = arith.constant 0 : i32
    %c0_i32_0 = arith.constant 0 : i32
    return %c0_i32, %1 : i32, i32
  }
  func.func @transform_2(%arg0: i32, %arg1: i32) -> (i32, i32, i32) {
    %c0_i32 = arith.constant 0 : i32
    %c0_i32_0 = arith.constant 0 : i32
    %c0_i32_1 = arith.constant 0 : i32
    return %arg0, %c0_i32, %c0_i32_0 : i32, i32, i32
  }
  func.func @transform_3(%arg0: i32, %arg1: i32) -> (i32, i32, i32) {
    %c0_i32 = arith.constant 0 : i32
    %c0_i32_0 = arith.constant 0 : i32
    %c0_i32_1 = arith.constant 0 : i32
    return %arg0, %c0_i32, %c0_i32_0 : i32, i32, i32
  }
}

</mosaic_0001>

<bundles_post_ra>
// kernel: tpu_custom_call.1
= control target key start
LH: loop header
LB: loop body
LE: loop exit
PB: predicated region body
PF: predicated region fallthrough
CT: control target
= control target key end

     0   :  { %9 = vsyncpa [#allocation3], 0  ;;  %s520_s0 = inlined_call_operand.hbm [shape: f32[8,128], index: 0, kind: input, shape index: {}]   ;;  %s521_s1 = inlined_call_operand.hbm [shape: bf16[128,768], index: 1, kind: input, shape index: {}]   ;;  %s522_s2 = inlined_call_operand.vmem [shape: f32[1,8,1], index: 2, kind: output, shape index: {0}]   ;;  %s523_s3 = inlined_call_operand.vmem [shape: s32[1,8,1], index: 3, kind: output, shape index: {1}]  }
   0x1   :  { %s16_s14 = sshll.u32 %s520_s0, 4  ;;  %s17_s14 = int_to_ptr.hbm [resolvable:$true] %s16_s14 }
   0x2   :  { %10 = vsyncpa [#allocation5], 0  ;;  %s456_s15 = smov [#allocation2]   ;;  %s30_s19 = sshll.u32 %s521_s1, 4  ;;  %s31_s19 = int_to_ptr.hbm [resolvable:$true] %s30_s19 }
   0x3   :  { %s18_s16 = sshll.u32 %s456_s15, 4  ;;  %s457_s20 = smov [#allocation4]   ;;  %s19_s16 = int_to_ptr.vmem [resolvable:$true] %s18_s16 }
   0x4   :  { %21 = dma.hbm_to_vmem [thread:$0]  %s17_s14, 128, %s19_s16, [#allocation3]  }
   0x5   :  { %s32_s21 = sshll.u32 %s457_s20, 4  ;;  %s458_s22 = smov 384   ;;  %s33_s21 = int_to_ptr.vmem [resolvable:$true] %s32_s21 }
   0x6   :  { %s459_s23 = smov 24  }
   0x7   :  { %38 = dma.hbm_to_vmem [thread:$0]  %s31_s19, 6144, %s33_s21, [#allocation5], %s458_s22, %s458_s22, %s459_s23  }
   0x8   :  { %452 = dma.done.wait [#allocation3], 128  }
   0x9   :  { %453 = vsyncadd [#allocation3], 4294967168 }
   0xa   :  { %454 = dma.done.wait [#allocation5], 6144  }
   0xb   :  { %455 = vsyncadd [#allocation5], 4294961152  ;;  %v102_v0 = vld [vmem:[#allocation4 + $0x168] sm:$0xff]  ;;  %v99_v1 = vld [vmem:[#allocation4 + $0x150] sm:$0xff]  ;;  %vm53_vm0 = vcmask 7168  }
   0xc   :  { %v96_v2 = vld [vmem:[#allocation4 + $0x138] sm:$0xff]  ;;  %v195_v3 = vunpack.c.l.bf16 %v102_v0  ;;  %v196_v4 = vunpack.c.h.bf16 %v102_v0  ;;  %v189_v5 = vunpack.c.l.bf16 %v99_v1  ;;  %v190_v6 = vunpack.c.h.bf16 %v99_v1  ;;  %v93_v7 = vld [vmem:[#allocation4 + $0x120] sm:$0xff]  ;;  %v90_v10 = vld [vmem:[#allocation4 + $0x108] sm:$0xff] }
   0xd   :  { %v183_v8 = vunpack.c.l.bf16 %v96_v2  ;;  %v184_v9 = vunpack.c.h.bf16 %v96_v2  ;;  %v177_v11 = vunpack.c.l.bf16 %v93_v7  ;;  %v178_v12 = vunpack.c.h.bf16 %v93_v7  ;;  %v103_v13 = vld [vmem:[#allocation4 + $0x170] sm:$0xff]  ;;  %v100_v15 = vld [vmem:[#allocation4 + $0x158] sm:$0xff]  ;;  %v97_v18 = vld [vmem:[#allocation4 + $0x140] sm:$0xff] }
   0xe   :  { %201 = vmatpush.msra.mxu0 %v195_v3  ;;  %221 = vmatpush.msra.mxu1 %v196_v4  ;;  %v87_v14 = vld [vmem:[#allocation4 + $0xf0] sm:$0xff]  ;;  %v171_v16 = vunpack.c.l.bf16 %v90_v10  ;;  %v172_v17 = vunpack.c.h.bf16 %v90_v10  ;;  %v84_v19 = vld [vmem:[#allocation4 + $0xd8] sm:$0xff]  ;;  %v197_v20 = vunpack.c.l.bf16 %v103_v13  ;;  %v198_v21 = vunpack.c.h.bf16 %v103_v13  ;;  %v94_v26 = vld [vmem:[#allocation4 + $0x128] sm:$0xff] }
   0xf   :  { %v165_v22 = vunpack.c.l.bf16 %v87_v14  ;;  %v166_v23 = vunpack.c.h.bf16 %v87_v14  ;;  %v191_v24 = vunpack.c.l.bf16 %v100_v15  ;;  %v192_v25 = vunpack.c.h.bf16 %v100_v15  ;;  %v81_v27 = vld [vmem:[#allocation4 + $0xc0] sm:$0xff]  ;;  %v91_v32 = vld [vmem:[#allocation4 + $0x110] sm:$0xff]  ;;  %v78_v33 = vld [vmem:[#allocation4 + $0xa8] sm:$0xff] }
  0x10   :  { %202 = vmatpush.msra.mxu0 %v189_v5  ;;  %222 = vmatpush.msra.mxu1 %v190_v6  ;;  %v185_v28 = vunpack.c.l.bf16 %v97_v18  ;;  %v186_v29 = vunpack.c.h.bf16 %v97_v18  ;;  %v159_v30 = vunpack.c.l.bf16 %v84_v19  ;;  %v160_v31 = vunpack.c.h.bf16 %v84_v19  ;;  %v88_v38 = vld [vmem:[#allocation4 + $0xf8] sm:$0xff]  ;;  %v75_v39 = vld [vmem:[#allocation4 + $0x90] sm:$0xff]  ;;  %v85_v44 = vld [vmem:[#allocation4 + $0xe0] sm:$0xff] }
  0x11   :  { %241 = vmatpush.msra.mxu2 %v197_v20  ;;  %261 = vmatpush.msra.mxu3 %v198_v21  ;;  %v179_v34 = vunpack.c.l.bf16 %v94_v26  ;;  %v180_v35 = vunpack.c.h.bf16 %v94_v26  ;;  %v153_v36 = vunpack.c.l.bf16 %v81_v27  ;;  %v154_v37 = vunpack.c.h.bf16 %v81_v27  ;;  %v72_v45 = vld [vmem:[#allocation4 + $0x78] sm:$0xff]  ;;  %v82_v50 = vld [vmem:[#allocation4 + $0xc8] sm:$0xff]  ;;  %v69_v51 = vld [vmem:[#allocation4 + $0x60] sm:$0xff] }
  0x12   :  { %203 = vmatpush.msra.mxu0 %v183_v8  ;;  %223 = vmatpush.msra.mxu1 %v184_v9  ;;  %v173_v40 = vunpack.c.l.bf16 %v91_v32  ;;  %v174_v41 = vunpack.c.h.bf16 %v91_v32  ;;  %v147_v42 = vunpack.c.l.bf16 %v78_v33  ;;  %v148_v43 = vunpack.c.h.bf16 %v78_v33  ;;  %v79_v56 = vld [vmem:[#allocation4 + $0xb0] sm:$0xff]  ;;  %v66_v57 = vld [vmem:[#allocation4 + $0x48] sm:$0xff]  ;;  %v76_v62 = vld [vmem:[#allocation4 + $0x98] sm:$0xff] }
  0x13   :  { %242 = vmatpush.msra.mxu2 %v191_v24  ;;  %262 = vmatpush.msra.mxu3 %v192_v25  ;;  %v167_v46 = vunpack.c.l.bf16 %v88_v38  ;;  %v168_v47 = vunpack.c.h.bf16 %v88_v38  ;;  %v141_v48 = vunpack.c.l.bf16 %v75_v39  ;;  %v142_v49 = vunpack.c.h.bf16 %v75_v39  ;;  %v63_v63 = vld [vmem:[#allocation4 + $0x30] sm:$0xff]  ;;  %v73_v4 = vld [vmem:[#allocation4 + $0x80] sm:$0xff]  ;;  %v60_v5 = vld [vmem:[#allocation4 + $0x18] sm:$0xff] }
  0x14   :  { %204 = vmatpush.msra.mxu0 %v177_v11  ;;  %224 = vmatpush.msra.mxu1 %v178_v12  ;;  %v161_v52 = vunpack.c.l.bf16 %v85_v44  ;;  %v162_v53 = vunpack.c.h.bf16 %v85_v44  ;;  %v135_v54 = vunpack.c.l.bf16 %v72_v45  ;;  %v136_v55 = vunpack.c.h.bf16 %v72_v45  ;;  %v70_v10 = vld [vmem:[#allocation4 + $0x68] sm:$0xff]  ;;  %v57_v11 = vld [vmem:[#allocation4] sm:$0xff]  ;;  %v67_v19 = vld [vmem:[#allocation4 + $0x50] sm:$0xff] }
  0x15   :  { %243 = vmatpush.msra.mxu2 %v185_v28  ;;  %263 = vmatpush.msra.mxu3 %v186_v29  ;;  %v155_v58 = vunpack.c.l.bf16 %v82_v50  ;;  %v156_v59 = vunpack.c.h.bf16 %v82_v50  ;;  %v129_v60 = vunpack.c.l.bf16 %v69_v51  ;;  %v130_v61 = vunpack.c.h.bf16 %v69_v51  ;;  %v64_v25 = vld [vmem:[#allocation4 + $0x38] sm:$0xff]  ;;  %v98_v26 = vld [vmem:[#allocation4 + $0x148] sm:$0xff] }
  0x16   :  { %205 = vmatpush.msra.mxu0 %v171_v16  ;;  %225 = vmatpush.msra.mxu1 %v172_v17  ;;  %v149_v0 = vunpack.c.l.bf16 %v79_v56  ;;  %v150_v1 = vunpack.c.h.bf16 %v79_v56  ;;  %v123_v2 = vunpack.c.l.bf16 %v66_v57  ;;  %v124_v3 = vunpack.c.h.bf16 %v66_v57  ;;  %v104_v16 = vld [vmem:[#allocation4 + $0x178] sm:$0xff] }
  0x17   :  { %244 = vmatpush.msra.mxu2 %v179_v34  ;;  %264 = vmatpush.msra.mxu3 %v180_v35  ;;  %v143_v6 = vunpack.c.l.bf16 %v76_v62  ;;  %v144_v7 = vunpack.c.h.bf16 %v76_v62  ;;  %v117_v8 = vunpack.c.l.bf16 %v63_v63  ;;  %v118_v9 = vunpack.c.h.bf16 %v63_v63 }
  0x18   :  { %206 = vmatpush.msra.mxu0 %v165_v22  ;;  %226 = vmatpush.msra.mxu1 %v166_v23  ;;  %v137_v12 = vunpack.c.l.bf16 %v73_v4  ;;  %v138_v13 = vunpack.c.h.bf16 %v73_v4  ;;  %v111_v14 = vunpack.c.l.bf16 %v60_v5  ;;  %v112_v15 = vunpack.c.h.bf16 %v60_v5  ;;  %v101_v22 = vld [vmem:[#allocation4 + $0x160] sm:$0xff] }
  0x19   :  { %245 = vmatpush.msra.mxu2 %v173_v40  ;;  %265 = vmatpush.msra.mxu3 %v174_v41  ;;  %v131_v17 = vunpack.c.l.bf16 %v70_v10  ;;  %v132_v18 = vunpack.c.h.bf16 %v70_v10  ;;  %v105_v20 = vunpack.c.l.bf16 %v57_v11  ;;  %v106_v21 = vunpack.c.h.bf16 %v57_v11  ;;  %v488_v40 = vld [vmem:[#allocation2] sm:$0xff]  ;;  %v58_v41 = vld [vmem:[#allocation4 + $0x8] sm:$0xff] }
  0x1a   :  { %207 = vmatpush.msra.mxu0 %v159_v30  ;;  %227 = vmatpush.msra.mxu1 %v160_v31  ;;  %v199_v23 = vunpack.c.l.bf16 %v104_v16  ;;  %v200_v24 = vunpack.c.h.bf16 %v104_v16  ;;  %v125_v27 = vunpack.c.l.bf16 %v67_v19  ;;  %v126_v28 = vunpack.c.h.bf16 %v67_v19  ;;  %v95_v31 = vld [vmem:[#allocation4 + $0x130] sm:$0xff] }
  0x1b   :  { %246 = vmatpush.msra.mxu2 %v167_v46  ;;  %266 = vmatpush.msra.mxu3 %v168_v47  ;;  %v193_v29 = vunpack.c.l.bf16 %v101_v22  ;;  %v194_v30 = vunpack.c.h.bf16 %v101_v22  ;;  %v119_v32 = vunpack.c.l.bf16 %v64_v25  ;;  %v120_v33 = vunpack.c.h.bf16 %v64_v25  ;;  %v86_v47 = vld [vmem:[#allocation4 + $0xe8] sm:$0xff] }
  0x1c   :  { %208 = vmatpush.msra.mxu0 %v153_v36  ;;  %228 = vmatpush.msra.mxu1 %v154_v37  ;;  %v187_v34 = vunpack.c.l.bf16 %v98_v26  ;;  %v188_v35 = vunpack.c.h.bf16 %v98_v26  ;;  %v61_v36 = vld [vmem:[#allocation4 + $0x20] sm:$0xff]  ;;  %v92_v37 = vld [vmem:[#allocation4 + $0x118] sm:$0xff]  ;;  %v181_v38 = vunpack.c.l.bf16 %v95_v31  ;;  %v182_v39 = vunpack.c.h.bf16 %v95_v31 }
  0x1d   :  { %247 = vmatpush.msra.mxu2 %v161_v52  ;;  %267 = vmatpush.msra.mxu3 %v162_v53  ;;  %v114_v44 = vunpack.c.h.bf16 %v61_v36  ;;  %v175_v45 = vunpack.c.l.bf16 %v92_v37  ;;  %v176_v46 = vunpack.c.h.bf16 %v92_v37  ;;  %v83_v52 = vld [vmem:[#allocation4 + $0xd0] sm:$0xff]  ;;  %v163_v53 = vunpack.c.l.bf16 %v86_v47 }
  0x1e   :  { %209 = vmatpush.msra.mxu0 %v147_v42  ;;  %229 = vmatpush.msra.mxu1 %v148_v43  ;;  %v89_v42 = vld [vmem:[#allocation4 + $0x100] sm:$0xff]  ;;  %v113_v43 = vunpack.c.l.bf16 %v61_v36  ;;  %v157_v56 = vunpack.c.l.bf16 %v83_v52  ;;  %v158_v57 = vunpack.c.h.bf16 %v83_v52  ;;  %v461_v52 = vmov 0  }
  0x1f   :  { %248 = vmatpush.msra.mxu2 %v155_v58  ;;  %268 = vmatpush.msra.mxu3 %v156_v59  ;;  %v169_v50 = vunpack.c.l.bf16 %v89_v42  ;;  %v170_v51 = vunpack.c.h.bf16 %v89_v42  ;;  %v77_v58 = vld [vmem:[#allocation4 + $0xa0] sm:$0xff]  ;;  %55 = vst.msk [vmem:[%s523_s3] sm:$0xff] %vm53_vm0, %v461_v52 }
  0x20   :  { %210 = vmatpush.msra.mxu0 %v141_v48  ;;  %230 = vmatpush.msra.mxu1 %v142_v49  ;;  %v107_v48 = vunpack.c.l.bf16 %v58_v41  ;;  %v108_v49 = vunpack.c.h.bf16 %v58_v41  ;;  %v145_v62 = vunpack.c.l.bf16 %v77_v58  ;;  %v146_v63 = vunpack.c.h.bf16 %v77_v58 }
  0x21   :  { %249 = vmatpush.msra.mxu2 %v149_v0  ;;  %269 = vmatpush.msra.mxu3 %v150_v1  ;;  %v71_v0 = vld [vmem:[#allocation4 + $0x70] sm:$0xff] }
  0x22   :  { %211 = vmatpush.msra.mxu0 %v135_v54  ;;  %231 = vmatpush.msra.mxu1 %v136_v55  ;;  %v164_v54 = vunpack.c.h.bf16 %v86_v47  ;;  %v80_v55 = vld [vmem:[#allocation4 + $0xb8] sm:$0xff]  ;;  %v133_v4 = vunpack.c.l.bf16 %v71_v0  ;;  %v134_v5 = vunpack.c.h.bf16 %v71_v0 }
  0x23   :  { %250 = vmatpush.msra.mxu2 %v143_v6  ;;  %270 = vmatpush.msra.mxu3 %v144_v7  ;;  %v151_v59 = vunpack.c.l.bf16 %v80_v55  ;;  %v65_v6 = vld [vmem:[#allocation4 + $0x40] sm:$0xff] }
  0x24   :  { %212 = vmatpush.msra.mxu0 %v129_v60  ;;  %232 = vmatpush.msra.mxu1 %v130_v61  ;;  %v152_v60 = vunpack.c.h.bf16 %v80_v55  ;;  %v74_v61 = vld [vmem:[#allocation4 + $0x88] sm:$0xff]  ;;  %v121_v10 = vunpack.c.l.bf16 %v65_v6  ;;  %v122_v11 = vunpack.c.h.bf16 %v65_v6 }
  0x25   :  { %251 = vmatpush.msra.mxu2 %v137_v12  ;;  %271 = vmatpush.msra.mxu3 %v138_v13  ;;  %v139_v1 = vunpack.c.l.bf16 %v74_v61  ;;  %v59_v12 = vld [vmem:[#allocation4 + $0x10] sm:$0xff] }
  0x26   :  { %213 = vmatpush.msra.mxu0 %v123_v2  ;;  %233 = vmatpush.msra.mxu1 %v124_v3  ;;  %v140_v2 = vunpack.c.h.bf16 %v74_v61  ;;  %v68_v3 = vld [vmem:[#allocation4 + $0x58] sm:$0xff]  ;;  %v110_v16 = vunpack.c.h.bf16 %v59_v12  ;;  %v381_v61 = vld [vmem:[%s523_s3] sm:$0xff] }
  0x27   :  { %252 = vmatpush.msra.mxu2 %v131_v17  ;;  %272 = vmatpush.msra.mxu3 %v132_v18  ;;  %v127_v7 = vunpack.c.l.bf16 %v68_v3 }
  0x28   :  { %214 = vmatpush.msra.mxu0 %v117_v8  ;;  %234 = vmatpush.msra.mxu1 %v118_v9  ;;  %v128_v8 = vunpack.c.h.bf16 %v68_v3  ;;  %v62_v9 = vld [vmem:[#allocation4 + $0x28] sm:$0xff] }
  0x29   :  { %253 = vmatpush.msra.mxu2 %v125_v27  ;;  %273 = vmatpush.msra.mxu3 %v126_v28  ;;  %v115_v13 = vunpack.c.l.bf16 %v62_v9  ;;  %v460_v28 = vmov -inf  }
  0x2a   :  { %215 = vmatpush.msra.mxu0 %v111_v14  ;;  %235 = vmatpush.msra.mxu1 %v112_v15  ;;  %v116_v14 = vunpack.c.h.bf16 %v62_v9  ;;  %v109_v15 = vunpack.c.l.bf16 %v59_v12  ;;  %54 = vst.msk [vmem:[%s522_s2] sm:$0xff] %vm53_vm0, %v460_v28 }
  0x2b   :  { %254 = vmatpush.msra.mxu2 %v119_v32  ;;  %274 = vmatpush.msra.mxu3 %v120_v33 }
  0x2c   :  { %216 = vmatpush.msra.mxu0 %v105_v20  ;;  %236 = vmatpush.msra.mxu1 %v106_v21 }
  0x2d   :  { %217 = vmatmul.f32.vlgmr.msra.gmra.mxu0 %v488_v40  ;;  %237 = vmatmul.f32.vlgmr.msra.gmra.mxu1 %v488_v40 }
  0x2e   :  { %281 = vmatpush.msrb.mxu0 %v199_v23  ;;  %301 = vmatpush.msrb.mxu1 %v200_v24 }
  0x2f   :  { %255 = vmatpush.msra.mxu2 %v113_v43  ;;  %275 = vmatpush.msra.mxu3 %v114_v44 }
  0x30   :  { %282 = vmatpush.msrb.mxu0 %v193_v29  ;;  %302 = vmatpush.msrb.mxu1 %v194_v30  ;;  %v323_v29 = vlaneseq }
  0x31   :  { %256 = vmatpush.msra.mxu2 %v107_v48  ;;  %276 = vmatpush.msra.mxu3 %v108_v49  ;;  %v380_v37 = vld [vmem:[%s522_s2] sm:$0xff] }
  0x32   :  { %283 = vmatpush.msrb.mxu0 %v187_v34  ;;  %303 = vmatpush.msrb.mxu1 %v188_v35  ;;  %v324_v30 = vand.u32 127, %v323_v29 }
  0x33   :  { %257 = vmatmul.f32.vlgmr.msra.gmra.mxu2 %v488_v40  ;;  %277 = vmatmul.f32.vlgmr.msra.gmra.mxu3 %v488_v40 }
  0x34   :  { %284 = vmatpush.msrb.mxu0 %v181_v38  ;;  %304 = vmatpush.msrb.mxu1 %v182_v39  ;;  %v325_v31 = vadd.s32 128, %v324_v30  ;;  %v326_v32 = vadd.s32 256, %v324_v30  ;;  %v327_v33 = vadd.s32 384, %v324_v30  ;;  %v328_v34 = vadd.s32 512, %v324_v30 }
  0x35   :  { %v329_v36 = vadd.s32 640, %v324_v30 }
  0x36   :  { %285 = vmatpush.msrb.mxu0 %v175_v45  ;;  %305 = vmatpush.msrb.mxu1 %v176_v46 }
  0x38   :  { %286 = vmatpush.msrb.mxu0 %v169_v50  ;;  %306 = vmatpush.msrb.mxu1 %v170_v51 }
  0x3a   :  { %287 = vmatpush.msrb.mxu0 %v163_v53  ;;  %307 = vmatpush.msrb.mxu1 %v164_v54 }
  0x3c   :  { %288 = vmatpush.msrb.mxu0 %v157_v56  ;;  %308 = vmatpush.msrb.mxu1 %v158_v57 }
  0x3e   :  { %289 = vmatpush.msrb.mxu0 %v151_v59  ;;  %309 = vmatpush.msrb.mxu1 %v152_v60 }
  0x40   :  { %290 = vmatpush.msrb.mxu0 %v145_v62  ;;  %310 = vmatpush.msrb.mxu1 %v146_v63 }
  0x42   :  { %291 = vmatpush.msrb.mxu0 %v139_v1  ;;  %311 = vmatpush.msrb.mxu1 %v140_v2 }
  0x44   :  { %292 = vmatpush.msrb.mxu0 %v133_v4  ;;  %312 = vmatpush.msrb.mxu1 %v134_v5 }
  0x46   :  { %293 = vmatpush.msrb.mxu0 %v127_v7  ;;  %313 = vmatpush.msrb.mxu1 %v128_v8 }
  0x48   :  { %294 = vmatpush.msrb.mxu0 %v121_v10  ;;  %314 = vmatpush.msrb.mxu1 %v122_v11 }
  0x4a   :  { %295 = vmatpush.msrb.mxu0 %v115_v13  ;;  %315 = vmatpush.msrb.mxu1 %v116_v14 }
  0x4c   :  { %296 = vmatpush.msrb.mxu0 %v109_v15  ;;  %316 = vmatpush.msrb.mxu1 %v110_v16 }
  0x4d   :  { %297 = vmatmul.f32.vlgmr.msrb.gmra.mxu0 %v488_v40  ;;  %317 = vmatmul.f32.vlgmr.msrb.gmra.mxu1 %v488_v40 }
  0xaa   :  { %v218_v17 = vpop.f32.mrf.mxu0  ;;  %v238_v18 = vpop.f32.mrf.mxu1 }
  0xb6   :  { %v258_v19 = vpop.f32.mrf.mxu2  ;;  %v278_v20 = vpop.f32.mrf.mxu3 }
  0xb7   :  { %v340_v25 = vmax.f32 %v258_v19, %v278_v20 }
  0xca   :  { %v298_v21 = vpop.f32.mrf.mxu0  ;;  %v318_v22 = vpop.f32.mrf.mxu1 }
  0xcb   :  { %v337_v23 = vmax.f32 %v218_v17, %v298_v21  ;;  %v338_v24 = vmax.f32 %v238_v18, %v318_v22 }
  0xcd   :  { %v339_v26 = vmax.f32 %v337_v23, %v338_v24 }
  0xcf   :  { %v341_v27 = vmax.f32 %v339_v26, %v340_v25 }
  0xd1   :  { %342 = vmax.xlane.f32.xlu0 %v341_v27 }
 0x144   :  { %v343_v35 = vpop.xlane.xlu0 %342 }
 0x145   :  { %vm344_vm1 = vcmp.eq.f32.partialorder %v218_v17, %v343_v35  ;;  %vm345_vm2 = vcmp.eq.f32.partialorder %v238_v18, %v343_v35  ;;  %vm346_vm3 = vcmp.eq.f32.partialorder %v258_v19, %v343_v35  ;;  %vm347_vm4 = vcmp.eq.f32.partialorder %v278_v20, %v343_v35 }
 0x146   :  { %vm348_vm5 = vcmp.eq.f32.partialorder %v298_v21, %v343_v35  ;;  %vm349_vm6 = vcmp.eq.f32.partialorder %v318_v22, %v343_v35  ;;  %v350_v38 = vsel %vm344_vm1, %v324_v30, 2147483647  ;;  %v351_v39 = vsel %vm345_vm2, %v325_v31, 2147483647 }
 0x147   :  { %v352_v40 = vsel %vm346_vm3, %v326_v32, 2147483647  ;;  %v353_v41 = vsel %vm347_vm4, %v327_v33, 2147483647  ;;  %v354_v42 = vsel %vm348_vm5, %v328_v34, 2147483647  ;;  %vm382_vm7 = vcmp.gt.f32.partialorder %v343_v35, %v380_v37 }
 0x148   :  { %v355_v43 = vsel %vm349_vm6, %v329_v36, 2147483647  ;;  %vm356_vm8 = vcmp.lt.s32.totalorder %v350_v38, %v354_v42  ;;  %v383_v44 = vsel %vm382_vm7, %v343_v35, %v380_v37  ;;  %vm362_vm10 = vcmp.lt.s32.totalorder %v352_v40, %v353_v41 }
 0x149   :  { %v357_v45 = vsel %vm356_vm8, %v350_v38, %v354_v42  ;;  %vm358_vm9 = vcmp.lt.s32.totalorder %v351_v39, %v355_v43  ;;  %385 = vst.msk [vmem:[%s522_s2] sm:$0xff] %vm53_vm0, %v383_v44  ;;  %v363_v48 = vsel %vm362_vm10, %v352_v40, %v353_v41 }
 0x14a   :  { %v359_v46 = vsel %vm358_vm9, %v351_v39, %v355_v43 }
 0x14b   :  { %vm360_vm11 = vcmp.lt.s32.totalorder %v357_v45, %v359_v46 }
 0x14c   :  { %v361_v47 = vsel %vm360_vm11, %v357_v45, %v359_v46 }
 0x14d   :  { %vm364_vm12 = vcmp.lt.s32.totalorder %v361_v47, %v363_v48 }
 0x14e   :  { %v365_v49 = vsel %vm364_vm12, %v361_v47, %v363_v48 }
 0x14f   :  { %v367_v50 = vshra.s32 %v365_v49, 16  ;;  %v366_v53 = vand.u32 65535, %v365_v49 }
 0x151   :  { %v369_v51 = vcvt.s32.f32 %v367_v50  ;;  %v368_v55 = vcvt.s32.f32 %v366_v53 }
 0x153   :  { %370 = vmin.xlane.f32.xlu0 %v369_v51 }
 0x1c6   :  { %v371_v54 = vpop.xlane.xlu0 %370 }
 0x1c7   :  { %vm372_vm13 = vcmp.eq.f32.partialorder %v369_v51, %v371_v54  ;;  %v377_v57 = vcvt.f32.s32 %v371_v54 }
 0x1c8   :  { %v373_v56 = vsel %vm372_vm13, %v368_v55, inf }
 0x1c9   :  { %374 = vmin.xlane.f32.xlu1 %v373_v56  ;;  %v378_v59 = vshll.u32 %v377_v57, 16 }
 0x23c   :  { %v375_v58 = vpop.xlane.xlu1 %374 }
 0x23d   :  { %v376_v60 = vcvt.f32.s32 %v375_v58 }
 0x23f   :  { %v379_v62 = vadd.s32 %v378_v59, %v376_v60 }
 0x241   :  { %v386_v63 = vsel %vm382_vm7, %v379_v62, %v381_v61 }
 0x242   :  { %387 = vst.msk [vmem:[%s523_s3] sm:$0xff] %vm53_vm0, %v386_v63 }
 0x243   :  { %396 = vsyncpa [#allocation3], 1 }
 0x244   :  { %397 = vsyncpa [#allocation5], 1 }

</bundles_post_ra>
